<compile_context>
chip_gen: v7x
topology: tpu7x:2x2x1
jax: 0.10.0
libtpu: 0.0.40
codegen_flags: <defaults>
</compile_context>

<pallas_src>
import functools

import jax
import jax.numpy as jnp
from jax import lax
from jax.experimental import pallas as pl
from jax.experimental.pallas import tpu as pltpu

_LANE = 128
_NEG_BIG = -1e30                     # large-negative mask (avoids inf-inf corners)
_V7X_SAFE_VMEM_BUDGET = 24 << 20     # per-step budget; v7x has only 64 MiB VMEM/TC
# TODO(synk): on v5e/v6e (128 MiB physical VMEM) this budget can be raised to
# ~48 MiB and the x BlockSpec could use pipeline_mode=pl.Buffered(3) if DMA
# latency is still exposed at the chosen tile.


def _round_up(x, m):
    return (x + m - 1) // m * m


def _vmem_footprint_bytes(tn, c, ep, hp, mm_size):
    """Rough per-grid-step VMEM footprint for an instance tile of tn rows."""
    c_lane = _round_up(c, _LANE)            # x lanes round up to 128 in VMEM
    c_sub = _round_up(c, 8)
    x_buffers = 2 * tn * c_lane * 4         # double-buffered streamed x (f32)
    intermediates = 2 * tn * (ep + hp) * 4  # h, a activations + temp headroom
    weights = 2 * (c_sub * ep + ep * hp) * mm_size + 2 * 3 * hp * 4
    return x_buffers + intermediates + weights + (1 << 20)


def abmil_kernel(x_ref, w1_ref, b1_ref, w2_ref, b2_ref, w3_ref,
                 m_ref, l_ref, acc_ref, *,
                 n_valid, tile_n, tiles_per_split, matmul_dtype):
    split = pl.program_id(1)
    i = pl.program_id(2)          # instance-tile index within split ("arbitrary")

    @pl.when(i == 0)
    def _init():
        m_ref[...] = jnp.full_like(m_ref, _NEG_BIG)
        l_ref[...] = jnp.zeros_like(l_ref)
        acc_ref[...] = jnp.zeros_like(acc_ref)

    # Row-validity mask for partial / dead tiles (x arrives unpadded in N).
    tile = split * tiles_per_split + i
    rows_left = n_valid - tile * tile_n
    row = lax.broadcasted_iota(jnp.int32, (tile_n, 1), 0)
    row_ok = row < rows_left

    # Zero invalid rows BEFORE any matmul (so garbage VMEM can never reach the
    # accumulators), then cast to the MXU dtype in-kernel (no HBM copy).
    x = jnp.where(row_ok, x_ref[...], 0.0).astype(matmul_dtype)      # (TN, C)

    # fc1 -> ReLU (dropout1 identity at inference); f32 MXU accumulation.
    h = jnp.dot(x, w1_ref[...], preferred_element_type=jnp.float32) + b1_ref[...]
    h = jnp.maximum(h, 0.0)                                          # (TN, Ep)

    # fc2 -> tanh (dropout2 identity).
    a = jnp.dot(h.astype(w2_ref.dtype), w2_ref[...],
                preferred_element_type=jnp.float32) + b2_ref[...]
    a = jnp.tanh(a)                                                  # (TN, Hp)

    # fc3 (no bias): width-1 output -> VPU multiply + lane reduce (skip MXU).
    s = jnp.sum(a * w3_ref[...], axis=-1, keepdims=True)             # (TN, 1)
    s = jnp.where(row_ok, s, _NEG_BIG)

    # Online softmax over the instance axis (per bag, per split).
    m_prev = m_ref[...]
    m_new = jnp.maximum(m_prev, jnp.max(s, axis=0, keepdims=True))   # (1, 1)
    alpha = jnp.exp(m_prev - m_new)
    p = jnp.where(row_ok, jnp.exp(s - m_new), 0.0)                   # (TN, 1)
    l_ref[...] = alpha * l_ref[...] + jnp.sum(p, axis=0, keepdims=True)

    # Attention-weighted pooling of h as a rank-1 MXU contraction over the
    # instance (sublane) axis: (TN,1) x (TN,Ep) -> (1,Ep). Frees VALU/XLU slots.
    pooled = lax.dot_general(
        p.astype(matmul_dtype), h.astype(matmul_dtype),
        (((0,), (0,)), ((), ())), preferred_element_type=jnp.float32)
    acc_ref[...] = alpha * acc_ref[...] + pooled
    m_ref[...] = m_new


def abmil_forward_batched(x, w1, b1, w2, b2, w3, wc, bc, *,
                          tile_n=1024, n_splits=None,
                          matmul_dtype=jnp.bfloat16):
    """ABMIL forward for a batch of bags: x (B, N, C) -> (B,) risks."""
    B, N, C = x.shape
    E = w1.shape[1]
    H = w2.shape[1]

    # Only the tiny resident weights get lane-padded; x stays untouched.
    # (On v6e/v7x with E,H > 128 one could pad to multiples of 256 to fill the
    # 256-wide MXU; minor for this HBM-bound kernel.)
    Ep = _round_up(E, _LANE)
    Hp = _round_up(H, _LANE)
    mm_size = jnp.dtype(matmul_dtype).itemsize

    # Instance tile: as large as the v7x-safe VMEM budget allows (sweepable).
    TN = max(8, min(_round_up(tile_n, 8), _round_up(N, 8)))
    while TN > 128 and _vmem_footprint_bytes(TN, C, Ep, Hp, mm_size) > _V7X_SAFE_VMEM_BUDGET:
        TN = max(128, _round_up(TN // 2, 8))
    footprint = _vmem_footprint_bytes(TN, C, Ep, Hp, mm_size)

    NT_total = pl.cdiv(N, TN)
    # Split the instance axis across a second "parallel" grid dim so B == 1
    # still uses both TensorCores on v7x; partial softmax states are merged
    # exactly (f32) in the JAX epilogue below.
    if n_splits is None:
        n_splits = 2 if B == 1 else 1
    S = max(1, min(int(n_splits), NT_total))
    NT_per = pl.cdiv(NT_total, S)

    if S * NT_per == NT_total:
        x_map = lambda b, s, i: (b, s * NT_per + i, 0)
    else:
        last_tile = NT_total - 1   # clamp dead trailing tiles (rows masked in-kernel)
        x_map = lambda b, s, i: (b, jnp.minimum(s * NT_per + i, last_tile), 0)

    # Wrapper-side padding/casting only for the small resident operands.
    w1p = jnp.pad(w1, ((0, 0), (0, Ep - E))).astype(matmul_dtype)
    b1p = jnp.pad(b1.reshape(1, E), ((0, 0), (0, Ep - E))).astype(jnp.float32)
    w2p = jnp.pad(w2, ((0, Ep - E), (0, Hp - H))).astype(matmul_dtype)
    b2p = jnp.pad(b2.reshape(1, H), ((0, 0), (0, Hp - H))).astype(jnp.float32)
    w3p = jnp.pad(w3.reshape(1, H), ((0, 0), (0, Hp - H))).astype(jnp.float32)

    kernel = functools.partial(
        abmil_kernel, n_valid=N, tile_n=TN, tiles_per_split=NT_per,
        matmul_dtype=matmul_dtype)

    m_out, l_out, acc_out = pl.pallas_call(
        kernel,
        out_shape=(
            jax.ShapeDtypeStruct((B, S, 1, 1), jnp.float32),    # running max m
            jax.ShapeDtypeStruct((B, S, 1, 1), jnp.float32),    # running denom l
            jax.ShapeDtypeStruct((B, S, 1, Ep), jnp.float32),   # running sum p*h
        ),
        grid_spec=pltpu.PrefetchScalarGridSpec(
            num_scalar_prefetch=0,
            grid=(B, S, NT_per),     # bags x N-splits (parallel) x N-tiles (arbitrary)
            in_specs=[
                # x streams in (TN, C) tiles straight from HBM (unpadded, f32).
                pl.BlockSpec((None, TN, C), x_map),
                pl.BlockSpec((C, Ep), lambda b, s, i: (0, 0)),
                pl.BlockSpec((1, Ep), lambda b, s, i: (0, 0)),
                pl.BlockSpec((Ep, Hp), lambda b, s, i: (0, 0)),
                pl.BlockSpec((1, Hp), lambda b, s, i: (0, 0)),
                pl.BlockSpec((1, Hp), lambda b, s, i: (0, 0)),
            ],
            out_specs=[
                pl.BlockSpec((None, None, 1, 1), lambda b, s, i: (b, s, 0, 0)),
                pl.BlockSpec((None, None, 1, 1), lambda b, s, i: (b, s, 0, 0)),
                pl.BlockSpec((None, None, 1, Ep), lambda b, s, i: (b, s, 0, 0)),
            ],
        ),
        compiler_params=pltpu.CompilerParams(
            dimension_semantics=("parallel", "parallel", "arbitrary"),
            vmem_limit_bytes=int(min(max(2 * footprint, 32 << 20), 48 << 20)),
        ),
    )(x, w1p, b1p, w2p, b2p, w3p)

    # Exact f32 epilogue (once per bag, negligible): merge the per-split
    # partial softmax states, normalize, apply the classifier head.
    m = m_out[:, :, 0, 0]                          # (B, S)
    l = l_out[:, :, 0, 0]                          # (B, S)
    acc = acc_out[:, :, 0, :]                      # (B, S, Ep)
    m_g = jnp.max(m, axis=1, keepdims=True)        # (B, 1)
    scale = jnp.exp(m - m_g)                       # (B, S)
    l_g = jnp.sum(l * scale, axis=1)               # (B,)
    z = jnp.sum(acc * scale[:, :, None], axis=1) / l_g[:, None]   # (B, Ep)
    risk = z[:, :E] @ wc.reshape(E) + bc.reshape(())              # (B,)
    return risk


def abmil_forward(x, w1, b1, w2, b2, w3, wc, bc, **kwargs):
    """Single-bag forward matching the nn.Module: x (N, C) -> scalar risk."""
    return abmil_forward_batched(x[None], w1, b1, w2, b2, w3, wc, bc, **kwargs)[0]


def init_params(key, C, embed_dim, hidden):
    """Deterministic synthetic parameters (shapes match the nn.Module)."""
    k1, k2, k3, k4, k5, k6, k7 = jax.random.split(key, 7)
    w1 = jax.random.normal(k1, (C, embed_dim), jnp.float32) * 0.1
    b1 = jax.random.normal(k2, (embed_dim,), jnp.float32) * 0.1
    w2 = jax.random.normal(k3, (embed_dim, hidden), jnp.float32) * 0.1
    b2 = jax.random.normal(k4, (hidden,), jnp.float32) * 0.1
    w3 = jax.random.normal(k5, (hidden, 1), jnp.float32) * 0.1      # fc3 (no bias)
    wc = jax.random.normal(k6, (embed_dim, 1), jnp.float32) * 0.1   # classifier
    bc = jax.random.normal(k7, (1,), jnp.float32) * 0.1
    return w1, b1, w2, b2, w3, wc, bc


def abmil_reference(x, w1, b1, w2, b2, w3, wc, bc):
    """Pure-JAX reference of the PyTorch forward (dropout = identity)."""
    h = jnp.maximum(x @ w1 + b1, 0.0)
    a = jnp.tanh(h @ w2 + b2)
    s = a @ w3
    w = jax.nn.softmax(s, axis=0)
    z = jnp.sum(w * h, axis=0)
    return (z @ wc + bc)[0]


if __name__ == "__main__":
    # 300 instances -> with tile_n=128: 3 tiles, last one partial (masking path).
    B, N, C = 2, 300, 16
    embed_dim, hidden = 32, 32

    key = jax.random.PRNGKey(0)
    kx, kp = jax.random.split(key)
    x = jax.random.normal(kx, (B, N, C), jnp.float32)
    params = init_params(kp, C, embed_dim, hidden)

    ref = jax.vmap(lambda xb: abmil_reference(xb, *params))(x)

    # f32 MXU path, small tile -> multi-tile online softmax with partial tile.
    out_f32 = jax.block_until_ready(
        abmil_forward_batched(x, *params, tile_n=128, matmul_dtype=jnp.float32))
    assert jnp.allclose(out_f32, ref, atol=5e-3, rtol=5e-3), (out_f32, ref)

    # bf16 MXU path with the default (large) instance tile.
    out_bf16 = jax.block_until_ready(
        abmil_forward_batched(x, *params, matmul_dtype=jnp.bfloat16))
    assert jnp.allclose(out_bf16, ref, atol=5e-2, rtol=5e-2), (out_bf16, ref)

    # Single-bag path with the instance axis split across two "parallel" grid
    # slots (v7x megacore for B == 1) -> exercises the partial-state combine,
    # including a clamped/dead fully-masked trailing tile.
    r0 = jax.block_until_ready(
        abmil_forward(x[0], *params, tile_n=128, n_splits=2,
                      matmul_dtype=jnp.float32))
    assert jnp.allclose(r0, ref[0], atol=5e-3, rtol=5e-3), (r0, ref[0])

    print("KERNEL_OK")
</pallas_src>

<mosaic_0001>
module attributes {stable_mosaic.version = 11 : i64} {
  func.func @abmil_kernel(%arg0: i32, %arg1: i32, %arg2: i32, %arg3: memref<1x128x16xf32, #tpu.memory_space<vmem>>, %arg4: memref<16x128xf32, #tpu.memory_space<vmem>>, %arg5: memref<1x128xf32, #tpu.memory_space<vmem>>, %arg6: memref<128x128xf32, #tpu.memory_space<vmem>>, %arg7: memref<1x128xf32, #tpu.memory_space<vmem>>, %arg8: memref<1x128xf32, #tpu.memory_space<vmem>>, %arg9: memref<1x1x1x1xf32, #tpu.memory_space<vmem>>, %arg10: memref<1x1x1x1xf32, #tpu.memory_space<vmem>>, %arg11: memref<1x1x1x128xf32, #tpu.memory_space<vmem>>) attributes {dimension_semantics = [#tpu.dimension_semantics<parallel>, #tpu.dimension_semantics<parallel>, #tpu.dimension_semantics<arbitrary>], iteration_bounds = array<i64: 2, 1, 3>, scalar_prefetch = 0 : i64, scratch_operands = 0 : i64, tpu.core_type = #tpu.core_type<tc>, window_params = [{transform_indices = @transform_0, window_bounds = array<i64: 1, 128, 16>}, {pipeline_mode = #tpu.pipeline_mode<synchronous>, transform_indices = @transform_1, window_bounds = array<i64: 16, 128>}, {pipeline_mode = #tpu.pipeline_mode<synchronous>, transform_indices = @transform_2, window_bounds = array<i64: 1, 128>}, {pipeline_mode = #tpu.pipeline_mode<synchronous>, transform_indices = @transform_3, window_bounds = array<i64: 128, 128>}, {pipeline_mode = #tpu.pipeline_mode<synchronous>, transform_indices = @transform_4, window_bounds = array<i64: 1, 128>}, {pipeline_mode = #tpu.pipeline_mode<synchronous>, transform_indices = @transform_5, window_bounds = array<i64: 1, 128>}, {transform_indices = @transform_6, window_bounds = array<i64: 1, 1, 1, 1>}, {transform_indices = @transform_7, window_bounds = array<i64: 1, 1, 1, 1>}, {transform_indices = @transform_8, window_bounds = array<i64: 1, 1, 1, 128>}]} {
    %c0_i32 = arith.constant 0 : i32
    %0 = arith.cmpi eq, %arg2, %c0_i32 : i32
    %1 = arith.extui %0 : i1 to i32
    %c0_i32_0 = arith.constant 0 : i32
    %2 = arith.cmpi ne, %1, %c0_i32_0 : i32
    scf.if %2 {
      %cst_46 = arith.constant -1.000000e+30 : f32
      %69 = vector.broadcast %cst_46 : f32 to vector<1x1xf32>
      %c0_47 = arith.constant 0 : index
      %c0_48 = arith.constant 0 : index
      %c0_49 = arith.constant 0 : index
      %c0_50 = arith.constant 0 : index
      %70 = vector.load %arg9[%c0_47, %c0_48, %c0_49, %c0_50] : memref<1x1x1x1xf32, #tpu.memory_space<vmem>>, vector<1x1x1x1xf32>
      %71 = vector.shape_cast %70 : vector<1x1x1x1xf32> to vector<1x1xf32>
      %72 = vector.shape_cast %69 : vector<1x1xf32> to vector<1x1x1x1xf32>
      tpu.vector_store %arg9[%c0_47, %c0_48, %c0_49, %c0_50], %72 {strides = array<i32>} : memref<1x1x1x1xf32, #tpu.memory_space<vmem>>, vector<1x1x1x1xf32>,
      %cst_51 = arith.constant 0.000000e+00 : f32
      %73 = vector.broadcast %cst_51 : f32 to vector<1x1xf32>
      %c0_52 = arith.constant 0 : index
      %c0_53 = arith.constant 0 : index
      %c0_54 = arith.constant 0 : index
      %c0_55 = arith.constant 0 : index
      %74 = vector.load %arg10[%c0_52, %c0_53, %c0_54, %c0_55] : memref<1x1x1x1xf32, #tpu.memory_space<vmem>>, vector<1x1x1x1xf32>
      %75 = vector.shape_cast %74 : vector<1x1x1x1xf32> to vector<1x1xf32>
      %76 = vector.shape_cast %73 : vector<1x1xf32> to vector<1x1x1x1xf32>
      tpu.vector_store %arg10[%c0_52, %c0_53, %c0_54, %c0_55], %76 {strides = array<i32>} : memref<1x1x1x1xf32, #tpu.memory_space<vmem>>, vector<1x1x1x1xf32>,
      %cst_56 = arith.constant 0.000000e+00 : f32
      %77 = vector.broadcast %cst_56 : f32 to vector<1x128xf32>
      %c0_57 = arith.constant 0 : index
      %c0_58 = arith.constant 0 : index
      %c0_59 = arith.constant 0 : index
      %c0_60 = arith.constant 0 : index
      %78 = vector.load %arg11[%c0_57, %c0_58, %c0_59, %c0_60] : memref<1x1x1x128xf32, #tpu.memory_space<vmem>>, vector<1x1x1x128xf32>
      %79 = vector.shape_cast %78 : vector<1x1x1x128xf32> to vector<1x128xf32>
      %80 = vector.shape_cast %77 : vector<1x128xf32> to vector<1x1x1x128xf32>
      tpu.vector_store %arg11[%c0_57, %c0_58, %c0_59, %c0_60], %80 {strides = array<i32>} : memref<1x1x1x128xf32, #tpu.memory_space<vmem>>, vector<1x1x1x128xf32>,
    } else {
    }
    %c3_i32 = arith.constant 3 : i32
    %3 = arith.muli %arg1, %c3_i32 : i32
    %4 = arith.addi %3, %arg2 : i32
    %c128_i32 = arith.constant 128 : i32
    %5 = arith.muli %4, %c128_i32 : i32
    %c300_i32 = arith.constant 300 : i32
    %6 = arith.subi %c300_i32, %5 : i32
    %7 = tpu.iota {dimensions = array<i32: 0>} : vector<128x1xi32>
    %8 = vector.broadcast %6 : i32 to vector<128x1xi32>
    %9 = arith.cmpi slt, %7, %8 : vector<128x1xi32>
    %c0 = arith.constant 0 : index
    %c0_1 = arith.constant 0 : index
    %c0_2 = arith.constant 0 : index
    %10 = vector.load %arg3[%c0, %c0_1, %c0_2] : memref<1x128x16xf32, #tpu.memory_space<vmem>>, vector<1x128x16xf32>
    %11 = vector.shape_cast %10 : vector<1x128x16xf32> to vector<128x16xf32>
    %cst = arith.constant 0.000000e+00 : f32
    %12 = vector.shape_cast %9 : vector<128x1xi1> to vector<128x1xi1>
    %13 = vector.broadcast %12 : vector<128x1xi1> to vector<128x16xi1>
    %14 = vector.broadcast %cst : f32 to vector<128x16xf32>
    %15 = arith.select %13, %11, %14 : vector<128x16xi1>, vector<128x16xf32>
    %c0_3 = arith.constant 0 : index
    %c0_4 = arith.constant 0 : index
    %16 = vector.load %arg4[%c0_3, %c0_4] : memref<16x128xf32, #tpu.memory_space<vmem>>, vector<16x128xf32>
    %cst_5 = arith.constant dense<0.000000e+00> : vector<128x128xf32>
    %17 = tpu.matmul %15, %16, %cst_5 {dimension_numbers = #tpu.dot_dimension_numbers<[1], [0], [0], [1], [0, 0, 1, 1], [], []>} : vector<128x16xf32>, vector<16x128xf32>, vector<128x128xf32> -> vector<128x128xf32>
    %c0_6 = arith.constant 0 : index
    %c0_7 = arith.constant 0 : index
    %18 = vector.load %arg5[%c0_6, %c0_7] : memref<1x128xf32, #tpu.memory_space<vmem>>, vector<1x128xf32>
    %19 = vector.broadcast %18 : vector<1x128xf32> to vector<128x128xf32>
    %20 = arith.addf %17, %19 : vector<128x128xf32>
    %cst_8 = arith.constant 0.000000e+00 : f32
    %21 = vector.broadcast %cst_8 : f32 to vector<128x128xf32>
    %22 = arith.maximumf %20, %21 : vector<128x128xf32>
    %c0_9 = arith.constant 0 : index
    %c0_10 = arith.constant 0 : index
    %23 = vector.load %arg6[%c0_9, %c0_10] : memref<128x128xf32, #tpu.memory_space<vmem>>, vector<128x128xf32>
    %cst_11 = arith.constant dense<0.000000e+00> : vector<128x128xf32>
    %24 = tpu.matmul %22, %23, %cst_11 {dimension_numbers = #tpu.dot_dimension_numbers<[1], [0], [0], [1], [0, 0, 1, 1], [], []>} : vector<128x128xf32>, vector<128x128xf32>, vector<128x128xf32> -> vector<128x128xf32>
    %c0_12 = arith.constant 0 : index
    %c0_13 = arith.constant 0 : index
    %25 = vector.load %arg7[%c0_12, %c0_13] : memref<1x128xf32, #tpu.memory_space<vmem>>, vector<1x128xf32>
    %26 = vector.broadcast %25 : vector<1x128xf32> to vector<128x128xf32>
    %27 = arith.addf %24, %26 : vector<128x128xf32>
    %28 = math.tanh %27 : vector<128x128xf32>
    %c0_14 = arith.constant 0 : index
    %c0_15 = arith.constant 0 : index
    %29 = vector.load %arg8[%c0_14, %c0_15] : memref<1x128xf32, #tpu.memory_space<vmem>>, vector<1x128xf32>
    %30 = vector.broadcast %29 : vector<1x128xf32> to vector<128x128xf32>
    %31 = arith.mulf %28, %30 : vector<128x128xf32>
    %cst_16 = arith.constant dense<0.000000e+00> : vector<128xf32>
    %32 = vector.multi_reduction <add>, %31, %cst_16 [1] : vector<128x128xf32> to vector<128xf32>
    %33 = vector.shape_cast %32 : vector<128xf32> to vector<128x1xf32>
    %cst_17 = arith.constant -1.000000e+30 : f32
    %34 = vector.broadcast %cst_17 : f32 to vector<128x1xf32>
    %35 = arith.select %9, %33, %34 : vector<128x1xi1>, vector<128x1xf32>
    %c0_18 = arith.constant 0 : index
    %c0_19 = arith.constant 0 : index
    %c0_20 = arith.constant 0 : index
    %c0_21 = arith.constant 0 : index
    %36 = vector.load %arg9[%c0_18, %c0_19, %c0_20, %c0_21] : memref<1x1x1x1xf32, #tpu.memory_space<vmem>>, vector<1x1x1x1xf32>
    %37 = vector.shape_cast %36 : vector<1x1x1x1xf32> to vector<1x1xf32>
    %cst_22 = arith.constant dense<0xFF800000> : vector<1xf32>
    %38 = vector.multi_reduction <maximumf>, %35, %cst_22 [0] : vector<128x1xf32> to vector<1xf32>
    %39 = vector.shape_cast %38 : vector<1xf32> to vector<1x1xf32>
    %40 = arith.maximumf %37, %39 : vector<1x1xf32>
    %41 = arith.subf %37, %40 : vector<1x1xf32>
    %42 = math.exp %41 : vector<1x1xf32>
    %43 = vector.broadcast %40 : vector<1x1xf32> to vector<128x1xf32>
    %44 = arith.subf %35, %43 : vector<128x1xf32>
    %45 = math.exp %44 : vector<128x1xf32>
    %cst_23 = arith.constant 0.000000e+00 : f32
    %46 = vector.broadcast %cst_23 : f32 to vector<128x1xf32>
    %47 = arith.select %9, %45, %46 : vector<128x1xi1>, vector<128x1xf32>
    %c0_24 = arith.constant 0 : index
    %c0_25 = arith.constant 0 : index
    %c0_26 = arith.constant 0 : index
    %c0_27 = arith.constant 0 : index
    %48 = vector.load %arg10[%c0_24, %c0_25, %c0_26, %c0_27] : memref<1x1x1x1xf32, #tpu.memory_space<vmem>>, vector<1x1x1x1xf32>
    %49 = vector.shape_cast %48 : vector<1x1x1x1xf32> to vector<1x1xf32>
    %50 = arith.mulf %42, %49 : vector<1x1xf32>
    %cst_28 = arith.constant dense<0.000000e+00> : vector<1xf32>
    %51 = vector.multi_reduction <add>, %47, %cst_28 [0] : vector<128x1xf32> to vector<1xf32>
    %52 = vector.shape_cast %51 : vector<1xf32> to vector<1x1xf32>
    %53 = arith.addf %50, %52 : vector<1x1xf32>
    %c0_29 = arith.constant 0 : index
    %c0_30 = arith.constant 0 : index
    %c0_31 = arith.constant 0 : index
    %c0_32 = arith.constant 0 : index
    %54 = vector.load %arg10[%c0_29, %c0_30, %c0_31, %c0_32] : memref<1x1x1x1xf32, #tpu.memory_space<vmem>>, vector<1x1x1x1xf32>
    %55 = vector.shape_cast %54 : vector<1x1x1x1xf32> to vector<1x1xf32>
    %56 = vector.shape_cast %53 : vector<1x1xf32> to vector<1x1x1x1xf32>
    tpu.vector_store %arg10[%c0_29, %c0_30, %c0_31, %c0_32], %56 {strides = array<i32>} : memref<1x1x1x1xf32, #tpu.memory_space<vmem>>, vector<1x1x1x1xf32>,
    %cst_33 = arith.constant dense<0.000000e+00> : vector<1x128xf32>
    %57 = tpu.matmul %47, %22, %cst_33 {dimension_numbers = #tpu.dot_dimension_numbers<[0], [0], [1], [1], [0, 1, 1, 1], [], []>} : vector<128x1xf32>, vector<128x128xf32>, vector<1x128xf32> -> vector<1x128xf32>
    %c0_34 = arith.constant 0 : index
    %c0_35 = arith.constant 0 : index
    %c0_36 = arith.constant 0 : index
    %c0_37 = arith.constant 0 : index
    %58 = vector.load %arg11[%c0_34, %c0_35, %c0_36, %c0_37] : memref<1x1x1x128xf32, #tpu.memory_space<vmem>>, vector<1x1x1x128xf32>
    %59 = vector.shape_cast %58 : vector<1x1x1x128xf32> to vector<1x128xf32>
    %60 = vector.broadcast %42 : vector<1x1xf32> to vector<1x128xf32>
    %61 = arith.mulf %60, %59 : vector<1x128xf32>
    %62 = arith.addf %61, %57 : vector<1x128xf32>
    %c0_38 = arith.constant 0 : index
    %c0_39 = arith.constant 0 : index
    %c0_40 = arith.constant 0 : index
    %c0_41 = arith.constant 0 : index
    %63 = vector.load %arg11[%c0_38, %c0_39, %c0_40, %c0_41] : memref<1x1x1x128xf32, #tpu.memory_space<vmem>>, vector<1x1x1x128xf32>
    %64 = vector.shape_cast %63 : vector<1x1x1x128xf32> to vector<1x128xf32>
    %65 = vector.shape_cast %62 : vector<1x128xf32> to vector<1x1x1x128xf32>
    tpu.vector_store %arg11[%c0_38, %c0_39, %c0_40, %c0_41], %65 {strides = array<i32>} : memref<1x1x1x128xf32, #tpu.memory_space<vmem>>, vector<1x1x1x128xf32>,
    %c0_42 = arith.constant 0 : index
    %c0_43 = arith.constant 0 : index
    %c0_44 = arith.constant 0 : index
    %c0_45 = arith.constant 0 : index
    %66 = vector.load %arg9[%c0_42, %c0_43, %c0_44, %c0_45] : memref<1x1x1x1xf32, #tpu.memory_space<vmem>>, vector<1x1x1x1xf32>
    %67 = vector.shape_cast %66 : vector<1x1x1x1xf32> to vector<1x1xf32>
    %68 = vector.shape_cast %40 : vector<1x1xf32> to vector<1x1x1x1xf32>
    tpu.vector_store %arg9[%c0_42, %c0_43, %c0_44, %c0_45], %68 {strides = array<i32>} : memref<1x1x1x1xf32, #tpu.memory_space<vmem>>, vector<1x1x1x1xf32>,
    return
  }
  func.func @transform_0(%arg0: i32, %arg1: i32, %arg2: i32) -> (i32, i32, i32) {
    %c3_i32 = arith.constant 3 : i32
    %0 = arith.muli %arg1, %c3_i32 : i32
    %1 = arith.addi %0, %arg2 : i32
    %c0_i32 = arith.constant 0 : i32
    %c0_i32_0 = arith.constant 0 : i32
    return %arg0, %1, %c0_i32 : i32, i32, i32
  }
  func.func @transform_1(%arg0: i32, %arg1: i32, %arg2: i32) -> (i32, i32) {
    %c0_i32 = arith.constant 0 : i32
    %c0_i32_0 = arith.constant 0 : i32
    %c0_i32_1 = arith.constant 0 : i32
    return %c0_i32, %c0_i32_0 : i32, i32
  }
  func.func @transform_2(%arg0: i32, %arg1: i32, %arg2: i32) -> (i32, i32) {
    %c0_i32 = arith.constant 0 : i32
    %c0_i32_0 = arith.constant 0 : i32
    %c0_i32_1 = arith.constant 0 : i32
    return %c0_i32, %c0_i32_0 : i32, i32
  }
  func.func @transform_3(%arg0: i32, %arg1: i32, %arg2: i32) -> (i32, i32) {
    %c0_i32 = arith.constant 0 : i32
    %c0_i32_0 = arith.constant 0 : i32
    %c0_i32_1 = arith.constant 0 : i32
    return %c0_i32, %c0_i32_0 : i32, i32
  }
  func.func @transform_4(%arg0: i32, %arg1: i32, %arg2: i32) -> (i32, i32) {
    %c0_i32 = arith.constant 0 : i32
    %c0_i32_0 = arith.constant 0 : i32
    %c0_i32_1 = arith.constant 0 : i32
    return %c0_i32, %c0_i32_0 : i32, i32
  }
  func.func @transform_5(%arg0: i32, %arg1: i32, %arg2: i32) -> (i32, i32) {
    %c0_i32 = arith.constant 0 : i32
    %c0_i32_0 = arith.constant 0 : i32
    %c0_i32_1 = arith.constant 0 : i32
    return %c0_i32, %c0_i32_0 : i32, i32
  }
  func.func @transform_6(%arg0: i32, %arg1: i32, %arg2: i32) -> (i32, i32, i32, i32) {
    %c0_i32 = arith.constant 0 : i32
    %c0_i32_0 = arith.constant 0 : i32
    %c0_i32_1 = arith.constant 0 : i32
    return %arg0, %arg1, %c0_i32, %c0_i32_0 : i32, i32, i32, i32
  }
  func.func @transform_7(%arg0: i32, %arg1: i32, %arg2: i32) -> (i32, i32, i32, i32) {
    %c0_i32 = arith.constant 0 : i32
    %c0_i32_0 = arith.constant 0 : i32
    %c0_i32_1 = arith.constant 0 : i32
    return %arg0, %arg1, %c0_i32, %c0_i32_0 : i32, i32, i32, i32
  }
  func.func @transform_8(%arg0: i32, %arg1: i32, %arg2: i32) -> (i32, i32, i32, i32) {
    %c0_i32 = arith.constant 0 : i32
    %c0_i32_0 = arith.constant 0 : i32
    %c0_i32_1 = arith.constant 0 : i32
    return %arg0, %arg1, %c0_i32, %c0_i32_0 : i32, i32, i32, i32
  }
}

</mosaic_0001>

<bundles_post_ra>
// kernel: tpu_custom_call.1
= control target key start
LH: loop header
LB: loop body
LE: loop exit
PB: predicated region body
PF: predicated region fallthrough
CT: control target
= control target key end

     0   :  { %14 = vsyncpa [#allocation3], 0  ;;  %s2613_s0 = inlined_call_operand.vmem [shape: f32[2,300,16], index: 0, kind: input, shape index: {}]   ;;  %s2614_s1 = inlined_call_operand.vmem [shape: f32[16,128], index: 1, kind: input, shape index: {}]   ;;  %s2615_s2 = inlined_call_operand.vmem [shape: f32[1,128], index: 2, kind: input, shape index: {}]   ;;  %s2616_s3 = inlined_call_operand.vmem [shape: f32[128,128], index: 3, kind: input, shape index: {}]   ;;  %s2617_s4 = inlined_call_operand.vmem [shape: f32[1,128], index: 4, kind: input, shape index: {}]   ;;  %s2618_s5 = inlined_call_operand.vmem [shape: f32[1,128], index: 5, kind: input, shape index: {}]   ;;  %s2619_s6 = inlined_call_operand.vmem [shape: f32[2,1,1,1], index: 6, kind: output, shape index: {0}]   ;;  %s2620_s7 = inlined_call_operand.vmem [shape: f32[2,1,1,1], index: 7, kind: output, shape index: {1}]   ;;  %s2621_s8 = inlined_call_operand.hbm [shape: f32[2,1,1,128], index: 8, kind: output, shape index: {2}]  }
   0x1   :  { %16 = vsyncpa [#allocation3 + $0x1], 0  ;;  %s1977_s27 = smov 0   ;;  %s1979_s28 = smov 0  }
   0x2   :  { %s1981_s29 = smov 0   ;;  %s1983_s30 = smov 0  }
   0x3   :  { %s1985_s9 = smov 0   ;;  %s1987_s10 = smov 0  }
   0x4   :  { %s1989_s11 = smov 0   ;;  %s1991_s12 = smov 0  }
   0x5 LB: > { %2630 = sst [smem:[#allocation5_spill]] %s1903_s29  ;;  %s1406_s13 = sadd.s32 4294967295, %s1923_s12   ;;  %s1923_s12 = sphi %s1991_s12, %s22_s12   ;;  %s1919_s11 = sphi %s1989_s11, %s2651_s11   ;;  %s1915_s10 = sphi %s1987_s10, %s2650_s10   ;;  %s1911_s9 = sphi %s1985_s9, %s2649_s9   ;;  %s1907_s30 = sphi %s1983_s30, %s2648_s30   ;;  %s1903_s29 = sphi %s1981_s29, %s2647_s29   ;;  %s1899_s28 = sphi %s1979_s28, %s2653_s28   ;;  %s1895_s27 = sphi %s1977_s27, %s2652_s27  }
   0x6   : > { %2631 = sst [smem:[#allocation6_spill]] %s1915_s10  ;;  %s1407_s14 = sadd.s32 4294967294, %s1923_s12  }
   0x7   : > { %2632 = sst [smem:[#allocation7_spill]] %s1919_s11  ;;  %s34_s15 = sadd.s32 1, %s1915_s10 }
   0x8   : > { %p35_p0 = scmp.ge.s32.totalorder %s34_s15, 3  ;;  %s41_s16 = sadd.s32 1, %s1919_s11 }
   0x9   : > { %p253_p1 = scmp.ne.s32.totalorder %s1903_s29, %s1899_s28  ;;  %p254_p2 = scmp.eq.s32.totalorder %s1406_s13, 5 }
   0xa   : > { %s2655_s15 = smov (%p35_p0, %s34_s15), 0  ;;  %s2657_s16 = smov (!%p35_p0, %s41_s16), %s1919_s11 }
   0xb   : > { %2633 = sst [smem:[#allocation8_spill]] %s2655_s15  ;;  %p2026_p3 = por %p254_p2, %p253_p1 }
   0xc   : > { %p259_p4 = scmp.ne.s32.totalorder %s1899_s28, %s1895_s27  ;;  %p43_p5 = scmp.ge.s32.totalorder %s2657_s16, 2 }
   0xd   : > { %p260_p6 = scmp.eq.s32.totalorder %s1407_s14, 5  ;;  %p1410_p7 = scmp.ge.s32.totalorder %s1923_s12, 1 }
   0xe   : > { %p318_p8 = scmp.lt.s32.totalorder %s1923_s12, 7  ;;  %s2659_s16 = smov (%p43_p5, %s2657_s16), 0 }
   0xf   : > { %2635 = sst [smem:[#allocation9_spill]] %s2659_s16  ;;  %p2036_p9 = por %p260_p6, %p259_p4 }
  0x10   : > { %p319_p10 = pnand %p1410_p7, %p318_p8  ;;  %s238_s19 = ssub.s32 %s1919_s11, %s2659_s16 }
  0x11   : > { %s2636_s18 = scalar_select %p2036_p9, 1, 0 }
  0x12   : > { %s243_s20 = sadd.s32 1, %s1903_s29  ;;  %p241_p11 = scmp.eq.s32.totalorder %s238_s19, 0 }
  0x13   : > { %2637 = sst [smem:[#allocation10_spill]] %s2636_s18  ;;  %322 = sbr.rel (%p319_p10) target bundleno = 1057 (0x421), region = 44 }
  0x14   : > { %s2044_s21 = scalar_select %p241_p11, %s1903_s29, %s243_s20  }
  0x15   : > { %s1411_s23 = sshll.u32 (!%p319_p10), %s1907_s30, 4  ;;  %p380_p12 = scmp.lt.s32.totalorder (!%p319_p10), %s1911_s9, 1 }
  0x16   : > { %2638 = sst [smem:[#allocation11_spill]] %s2044_s21  ;;  %p382_p13 = scmp.lt.s32.totalorder (!%p319_p10), %s1411_s23, 37 }
  0x17   : > { %s2639_s29 = sand.u32 (!%p319_p10), 1, %s1899_s28   ;;  %p1413_p0 = scmp.ne.s32.totalorder (!%p319_p10), %s1907_s30, 0 }
  0x18   : > { %s2067_s18 = scalar_lea.vmem (!%p319_p10), [#allocation2], %s2639_s29 }
  0x1a   : > { %s381_s24 = scalar_select %p380_p12, %s1911_s9, 1 }
  0x1b   : > { %s2661_s23 = smov (!%p382_p13, %s1411_s23), 37  ;;  %410 = sbr.rel (%p1413_p0) target bundleno = 34 (0x22), region = 48 }
  0x1c   : > { %s1683_s25 = smul.u32 38, %s381_s24  ;;  %s2053_s14 = scalar_lea.vmem %s2619_s6, %s381_s24  ;;  %vm411_vm0 = vcmask (!%p1413_p0), 0   ;;  %v1925_v0 = vmov (!%p1413_p0), -1e+30   ;;  %v1926_v1 = vmov (!%p1413_p0), 0.0  }
  0x1d   : > { %s2058_s16 = scalar_lea.vmem %s2620_s7, %s381_s24  ;;  %412 = vst.msk [vmem:[%s2053_s14] sm:$0x1] (!%p1413_p0), %vm411_vm0, %v1925_v0  ;;  %414 = vst [vmem:[%s2067_s18] sm:$0x1] (!%p1413_p0), %v1926_v1 }
  0x1e   : > { %s385_s15 = sadd.s32 %s1683_s25, %s2661_s23  ;;  %413 = vst.msk [vmem:[%s2058_s16] sm:$0x1] (!%p1413_p0), %vm411_vm0, %v1926_v1 }
  0x1f   : > { %s1412_s11 = sshll.u32 %s385_s15, 3 }
  0x20   : > { %s2063_s21 = scalar_lea.vmem %s2613_s0, %s1412_s11 }
  0x22 PF: > { %v517_v2 = vld [vmem:[%s2614_s1] sm:$0xff]  ;;  %v518_v3 = vld [vmem:[%s2614_s1 + $0x8] sm:$0xff]  ;;  %s1414_s22 = sshll.u32 %s1907_s30, 7  ;;  %v419_v4 = vlaneseq  ;;  %vm526_vm1 = vcmask 130048   ;;  %v455_v12 = vld [vmem:[%s2063_s21 + $0x10] sm:$0xff]  ;;  %s2644_s24 = sand.u32 1, %s1899_s28  }
  0x23   : > { %v1623_v5 = vpack.c.bf16 %v518_v3, %v517_v2  ;;  %s418_s23 = ssub.s32 300, %s1414_s22  ;;  %v453_v8 = vld [vmem:[%s2063_s21] sm:$0xff]  ;;  %v454_v10 = vld [vmem:[%s2063_s21 + $0x8] sm:$0xff]  ;;  %v456_v16 = vld [vmem:[%s2063_s21 + $0x18] sm:$0xff]  ;;  %s1278_s22 = sshll.u32 %s2067_s18, 4  ;;  %s2559_s22 = int_to_ptr.vmem [resolvable:$true] %s1278_s22 }
  0x24   : > { %v2080_v6 = vshrl.u32 %v419_v4, 7  ;;  %v2082_v7 = vstv %s418_s23  ;;  %v457_v20 = vld [vmem:[%s2063_s21 + $0x20] sm:$0xff]  ;;  %v458_v24 = vld [vmem:[%s2063_s21 + $0x28] sm:$0xff]  ;;  %v459_v26 = vld [vmem:[%s2063_s21 + $0x30] sm:$0xff]  ;;  %s1829_s25 = scalar_lea.vmem %s2559_s22, 16 }
  0x25   : > { %1624 = vmatprep.subr.bf16.mxu0 %v1623_v5  ;;  %v736_v28 = vld [vmem:[%s2616_s3] sm:$0xff]  ;;  %v737_v29 = vld [vmem:[%s2616_s3 + $0x8] sm:$0xff]  ;;  %v738_v31 = vld [vmem:[%s2616_s3 + $0x10] sm:$0xff]  ;;  %p1830_p1 = scmp.ne.s32.totalorder %s2559_s22, %s1829_s25 }
  0x26   : > { %1626 = vmatpush3.bf16.msra.mxu0 %v1623_v5  ;;  %vm437_vm2 = vcmp.lt.s32.totalorder %v2080_v6, %v2082_v7  ;;  %v2088_v9 = vadd.s32 8, %v2080_v6  ;;  %v2092_v11 = vadd.s32 16, %v2080_v6  ;;  %v2096_v13 = vadd.s32 24, %v2080_v6  ;;  %v739_v32 = vld [vmem:[%s2616_s3 + $0x18] sm:$0xff]  ;;  %v461_v36 = vld [vmem:[%s2063_s21 + $0x40] sm:$0xff]  ;;  %v741_v41 = vld [vmem:[%s2616_s3 + $0x28] sm:$0xff] }
  0x27   : > { %v501_v14 = vsel %vm437_vm2, %v453_v8, 0.0  ;;  %v2102_v15 = vadd.s32 32, %v2080_v6  ;;  %v2113_v17 = vadd.s32 40, %v2080_v6  ;;  %v2125_v21 = vadd.s32 48, %v2080_v6  ;;  %v460_v34 = vld [vmem:[%s2063_s21 + $0x38] sm:$0xff]  ;;  %v740_v40 = vld [vmem:[%s2616_s3 + $0x20] sm:$0xff]  ;;  %p1831_p2 = pnand %p1830_p1, %p2026_p3 }
  0x28   : > { %1508 = vmatprep.mubr.msk.f32.mxu0 %vm526_vm1, %v501_v14  ;;  %vm438_vm3 = vcmp.lt.s32.totalorder %v2088_v9, %v2082_v7  ;;  %vm439_vm4 = vcmp.lt.s32.totalorder %v2092_v11, %v2082_v7  ;;  %vm440_vm5 = vcmp.lt.s32.totalorder %v2096_v13, %v2082_v7  ;;  %v2139_v25 = vadd.s32 56, %v2080_v6  ;;  %v462_v44 = vld [vmem:[%s2063_s21 + $0x48] sm:$0xff]  ;;  %v463_v46 = vld [vmem:[%s2063_s21 + $0x50] sm:$0xff]  ;;  %v743_v50 = vld [vmem:[%s2616_s3 + $0x38] sm:$0xff] }
  0x29   : > { %v502_v18 = vsel %vm438_vm3, %v454_v10, 0.0  ;;  %v503_v19 = vsel %vm439_vm4, %v455_v12, 0.0  ;;  %vm441_vm6 = vcmp.lt.s32.totalorder %v2102_v15, %v2082_v7  ;;  %v504_v22 = vsel %vm440_vm5, %v456_v16, 0.0  ;;  %v742_v49 = vld [vmem:[%s2616_s3 + $0x30] sm:$0xff]  ;;  %v464_v53 = vld [vmem:[%s2063_s21 + $0x58] sm:$0xff]  ;;  %v465_v55 = vld [vmem:[%s2063_s21 + $0x60] sm:$0xff]  ;;  %p1832_p4 = pneg %p1831_p2 }
  0x2a   : > { %1509 = vmatmul.mubr.msk.f32.vlgmr.msra.gmra.mrb[0].mxu0 %vm526_vm1, %v502_v18  ;;  %v505_v23 = vsel %vm441_vm6, %v457_v20, 0.0  ;;  %vm442_vm7 = vcmp.lt.s32.totalorder %v2113_v17, %v2082_v7  ;;  %vm443_vm8 = vcmp.lt.s32.totalorder %v2125_v21, %v2082_v7  ;;  %v2145_v27 = vadd.s32 64, %v2080_v6  ;;  %v744_v58 = vld [vmem:[%s2616_s3 + $0x40] sm:$0xff]  ;;  %v745_v59 = vld [vmem:[%s2616_s3 + $0x48] sm:$0xff]  ;;  %v467_v0 = vld [vmem:[%s2063_s21 + $0x70] sm:$0xff] }
  0x2b   : > { %1511 = vmatprep.mubr.msk.f32.mxu0 %vm526_vm1, %v503_v19  ;;  %v506_v30 = vsel %vm442_vm7, %v458_v24, 0.0  ;;  %v507_v33 = vsel %vm443_vm8, %v459_v26, 0.0  ;;  %vm444_vm9 = vcmp.lt.s32.totalorder %v2139_v25, %v2082_v7  ;;  %v2171_v35 = vadd.s32 72, %v2080_v6  ;;  %v466_v62 = vld [vmem:[%s2063_s21 + $0x68] sm:$0xff]  ;;  %v746_v2 = vld [vmem:[%s2616_s3 + $0x50] sm:$0xff]  ;;  %v747_v3 = vld [vmem:[%s2616_s3 + $0x58] sm:$0xff] }
  0x2c   : > { %vm445_vm10 = vcmp.lt.s32.totalorder %v2145_v27, %v2082_v7  ;;  %v2177_v37 = vadd.s32 80, %v2080_v6  ;;  %v1627_v38 = vpack.c.bf16 %v737_v29, %v736_v28  ;;  %v1631_v39 = vpack.c.bf16 %v739_v32, %v738_v31  ;;  %v468_v8 = vld [vmem:[%s2063_s21 + $0x78] sm:$0xff]  ;;  %v748_v12 = vld [vmem:[%s2616_s3 + $0x60] sm:$0xff]  ;;  %v749_v14 = vld [vmem:[%s2616_s3 + $0x68] sm:$0xff]  ;;  %s1259_s21 = scalar_lea.sflag [#allocation3], %s2644_s24 }
  0x2d   : > { %v508_v42 = vsel %vm444_vm9, %v460_v34, 0.0  ;;  %v509_v43 = vsel %vm445_vm10, %v461_v36, 0.0  ;;  %vm446_vm11 = vcmp.lt.s32.totalorder %v2171_v35, %v2082_v7  ;;  %v2197_v45 = vadd.s32 88, %v2080_v6  ;;  %v750_v19 = vld [vmem:[%s2616_s3 + $0x70] sm:$0xff]  ;;  %v751_v20 = vld [vmem:[%s2616_s3 + $0x78] sm:$0xff] }
  0x2e   : > { %1512 = vmatmul.mubr.msk.f32.gmra.mrb[2].mxu0 %vm526_vm1, %v504_v22  ;;  %1628 = vmatprep.subr.bf16.mxu1 %v1627_v38  ;;  %vm447_vm12 = vcmp.lt.s32.totalorder %v2177_v37, %v2082_v7  ;;  %v2203_v47 = vadd.s32 96, %v2080_v6  ;;  %v1635_v48 = vpack.c.bf16 %v741_v41, %v740_v40  ;;  %v510_v51 = vsel %vm446_vm11, %v462_v44, 0.0  ;;  %v2293_v24 = vld [vmem:[%s2615_s2] ss:$0 sm:$0xff] }
  0x2f   : > { %1514 = vmatprep.mubr.msk.f32.mxu0 %vm526_vm1, %v505_v23  ;;  %1630 = vmatpush3.bf16.msra.mxu1 %v1627_v38  ;;  %v511_v52 = vsel %vm447_vm12, %v463_v46, 0.0  ;;  %vm448_vm13 = vcmp.lt.s32.totalorder %v2197_v45, %v2082_v7  ;;  %v2223_v54 = vadd.s32 104, %v2080_v6  ;;  %v2229_v56 = vadd.s32 112, %v2080_v6 }
  0x30   : > { %1632 = vmatprep.subr.bf16.mxu1 %v1631_v39  ;;  %vm2627_vm14 = vcmp.lt.s32.totalorder %v2203_v47, %v2082_v7  ;;  %v1639_v57 = vpack.c.bf16 %v743_v50, %v742_v49  ;;  %v512_v60 = vsel %vm448_vm13, %v464_v53, 0.0  ;;  %v2249_v63 = vadd.s32 120, %v2080_v6 }
  0x31   : > { %v513_v61 = vsel %vm2627_vm14, %v465_v55, 0.0  ;;  %vm450_vm15 = vcmp.lt.s32.totalorder %v2223_v54, %v2082_v7  ;;  %vm451_vm0 = vcmp.lt.s32.totalorder %v2229_v56, %v2082_v7  ;;  %v1643_v1 = vpack.c.bf16 %v745_v59, %v744_v58 }
  0x32   : > { %1515 = vmatmul.mubr.msk.f32.gmra.mrb[4].mxu0 %vm526_vm1, %v506_v30  ;;  %v514_v4 = vsel %vm450_vm15, %v466_v62, 0.0  ;;  %v515_v5 = vsel %vm451_vm0, %v467_v0, 0.0  ;;  %vm2629_vm14 = vcmp.lt.s32.totalorder %v2249_v63, %v2082_v7  ;;  %v1647_v10 = vpack.c.bf16 %v747_v3, %v746_v2 }
  0x33   : > { %1517 = vmatprep.mubr.msk.f32.mxu0 %vm526_vm1, %v507_v33  ;;  %1634 = vmatpush3.bf16.msra.mxu1 %v1631_v39  ;;  %v516_v16 = vsel %vm2629_vm14, %v468_v8, 0.0  ;;  %v1651_v18 = vpack.c.bf16 %v749_v14, %v748_v12  ;;  %v1655_v22 = vpack.c.bf16 %v751_v20, %v750_v19  ;;  %v1927_v23 = vmov 0.0|0.0  }
  0x34   : > { %1636 = vmatprep.subr.bf16.mxu1 %v1635_v48  ;;  %1659 = vmatprep.subr.bf16.mxu0 %v1927_v23 }
  0x36   : > { %1518 = vmatmul.mubr.msk.f32.gmra.mrb[6].mxu0 %vm526_vm1, %v508_v42 }
  0x37   : > { %1520 = vmatprep.mubr.msk.f32.mxu0 %vm526_vm1, %v509_v43  ;;  %1638 = vmatpush3.bf16.msra.mxu1 %v1635_v48 }
  0x38   : > { %1640 = vmatprep.subr.bf16.mxu1 %v1639_v57 }
  0x3a   : > { %1521 = vmatmul.mubr.msk.f32.gmra.mrb[8].mxu0 %vm526_vm1, %v510_v51 }
  0x3b   : > { %1523 = vmatprep.mubr.msk.f32.mxu0 %vm526_vm1, %v511_v52  ;;  %1642 = vmatpush3.bf16.msra.mxu1 %v1639_v57 }
  0x3c   : > { %1644 = vmatprep.subr.bf16.mxu1 %v1643_v1 }
  0x3e   : > { %1524 = vmatmul.mubr.msk.f32.gmra.mrb[10].mxu0 %vm526_vm1, %v512_v60 }
  0x3f   : > { %1526 = vmatprep.mubr.msk.f32.mxu0 %vm526_vm1, %v513_v61  ;;  %1646 = vmatpush3.bf16.msra.mxu1 %v1643_v1 }
  0x40   : > { %1648 = vmatprep.subr.bf16.mxu1 %v1647_v10 }
  0x42   : > { %1527 = vmatmul.mubr.msk.f32.gmra.mrb[12].mxu0 %vm526_vm1, %v514_v4 }
  0x43   : > { %1529 = vmatprep.mubr.msk.f32.mxu0 %vm526_vm1, %v515_v5  ;;  %1650 = vmatpush3.bf16.msra.mxu1 %v1647_v10 }
  0x44   : > { %1652 = vmatprep.subr.bf16.mxu1 %v1651_v18 }
  0x46   : > { %1530 = vmatmul.mubr.msk.f32.gmra.mrb[14].mxu0 %vm526_vm1, %v516_v16  ;;  %vm2640_vm1 = vcmp.lt.s32.totalorder %v2203_v47, %v2082_v7 }
  0x47   : > { %1654 = vmatpush3.bf16.msra.mxu1 %v1651_v18 }
  0x48   : > { %1656 = vmatprep.subr.bf16.mxu1 %v1655_v22 }
  0x4b   : > { %1658 = vmatpush3.bf16.msra.mxu1 %v1655_v22 }
  0xfd   : > { %v1510_v26 = vpop.f32.mrb[0].mxu0 }
  0xfe   : > { %v647_v28 = vadd.f32 %v1510_v26, %v2293_v24  ;;  %v641_v29 = vpop.f32.mrb[1].mxu0 }
  0xff   : > { %v642_v30 = vadd.f32 %v2293_v24, %v641_v29 }
 0x100   : > { %v721_v31 = vmax.f32 %v647_v28, 0.0 }
 0x101   : > { %v720_v32 = vmax.f32 %v642_v30, 0.0  ;;  %v1513_v33 = vpop.f32.mrb[2].mxu0 }
 0x102   : > { %v657_v34 = vadd.f32 %v1513_v33, %v2293_v24  ;;  %v651_v36 = vpop.f32.mrb[3].mxu0 }
 0x103   : > { %v1660_v38 = vpack.c.bf16 %v721_v31, %v720_v32  ;;  %v652_v39 = vadd.f32 %v2293_v24, %v651_v36  ;;  %1564 = vmatprep.mubr.f32.mxu1 %v720_v32 }
 0x104   : > { %v723_v40 = vmax.f32 %v657_v34, 0.0  ;;  %1565 = vmatmul.mubr.f32.vlgmr.msra.gmra.mrb[0].mxu1 %v721_v31 }
 0x105   : > { %v722_v41 = vmax.f32 %v652_v39, 0.0  ;;  %v1516_v42 = vpop.f32.mrb[4].mxu0  ;;  %1661 = vmatpush3.bf16.msra.mxu0 %v1660_v38 }
 0x106   : > { %v667_v43 = vadd.f32 %v1516_v42, %v2293_v24  ;;  %v661_v44 = vpop.f32.mrb[5].mxu0  ;;  %1662 = vmatprep.subr.bf16.mxu0 %v1927_v23 }
 0x107   : > { %v1663_v46 = vpack.c.bf16 %v723_v40, %v722_v41  ;;  %v662_v48 = vadd.f32 %v2293_v24, %v661_v44  ;;  %1567 = vmatprep.mubr.f32.mxu1 %v722_v41 }
 0x108   : > { %v725_v49 = vmax.f32 %v667_v43, 0.0  ;;  %1568 = vmatmul.mubr.f32.gmra.mrb[2].mxu1 %v723_v40  ;;  %v2321_v40 = vld [vmem:[%s2617_s4] ss:$0 sm:$0xff] }
 0x109   : > { %v724_v50 = vmax.f32 %v662_v48, 0.0  ;;  %v1519_v51 = vpop.f32.mrb[6].mxu0  ;;  %1664 = vmatpush3.bf16.msra.mxu0 %v1663_v46 }
 0x10a   : > { %v677_v52 = vadd.f32 %v1519_v51, %v2293_v24  ;;  %v671_v53 = vpop.f32.mrb[7].mxu0  ;;  %1665 = vmatprep.subr.bf16.mxu0 %v1927_v23 }
 0x10b   : > { %v1666_v55 = vpack.c.bf16 %v725_v49, %v724_v50  ;;  %v672_v57 = vadd.f32 %v2293_v24, %v671_v53  ;;  %1570 = vmatprep.mubr.f32.mxu1 %v724_v50  ;;  %v2332_v53 = vld [vmem:[%s2618_s5] ss:$0 sm:$0xff] }
 0x10c   : > { %v727_v58 = vmax.f32 %v677_v52, 0.0  ;;  %1571 = vmatmul.mubr.f32.gmra.mrb[4].mxu1 %v725_v49 }
 0x10d   : > { %v726_v59 = vmax.f32 %v672_v57, 0.0  ;;  %v1522_v60 = vpop.f32.mrb[8].mxu0  ;;  %1667 = vmatpush3.bf16.msra.mxu0 %v1666_v55 }
 0x10e   : > { %v687_v61 = vadd.f32 %v1522_v60, %v2293_v24  ;;  %v681_v62 = vpop.f32.mrb[9].mxu0  ;;  %1668 = vmatprep.subr.bf16.mxu0 %v1927_v23 }
 0x10f   : > { %v1669_v0 = vpack.c.bf16 %v727_v58, %v726_v59  ;;  %v682_v1 = vadd.f32 %v2293_v24, %v681_v62  ;;  %1573 = vmatprep.mubr.f32.mxu1 %v726_v59 }
 0x110   : > { %v729_v2 = vmax.f32 %v687_v61, 0.0  ;;  %1574 = vmatmul.mubr.f32.gmra.mrb[6].mxu1 %v727_v58 }
 0x111   : > { %v728_v3 = vmax.f32 %v682_v1, 0.0  ;;  %v1525_v4 = vpop.f32.mrb[10].mxu0  ;;  %1670 = vmatpush3.bf16.msra.mxu0 %v1669_v0 }
 0x112   : > { %v697_v5 = vadd.f32 %v1525_v4, %v2293_v24  ;;  %v691_v8 = vpop.f32.mrb[11].mxu0  ;;  %1671 = vmatprep.subr.bf16.mxu0 %v1927_v23 }
 0x113   : > { %v1672_v10 = vpack.c.bf16 %v729_v2, %v728_v3  ;;  %v692_v12 = vadd.f32 %v2293_v24, %v691_v8  ;;  %1576 = vmatprep.mubr.f32.mxu1 %v728_v3 }
 0x114   : > { %v731_v14 = vmax.f32 %v697_v5, 0.0  ;;  %1577 = vmatmul.mubr.f32.gmra.mrb[8].mxu1 %v729_v2 }
 0x115   : > { %v730_v16 = vmax.f32 %v692_v12, 0.0  ;;  %v1528_v18 = vpop.f32.mrb[12].mxu0  ;;  %1673 = vmatpush3.bf16.msra.mxu0 %v1672_v10 }
 0x116   : > { %v707_v19 = vadd.f32 %v1528_v18, %v2293_v24  ;;  %v701_v20 = vpop.f32.mrb[13].mxu0  ;;  %1674 = vmatprep.subr.bf16.mxu0 %v1927_v23 }
 0x117   : > { %v1675_v22 = vpack.c.bf16 %v731_v14, %v730_v16  ;;  %v702_v26 = vadd.f32 %v2293_v24, %v701_v20  ;;  %1579 = vmatprep.mubr.f32.mxu1 %v730_v16 }
 0x118   : > { %v733_v28 = vmax.f32 %v707_v19, 0.0  ;;  %1580 = vmatmul.mubr.f32.gmra.mrb[10].mxu1 %v731_v14 }
 0x119   : > { %v732_v29 = vmax.f32 %v702_v26, 0.0  ;;  %v1531_v30 = vpop.f32.mrb[14].mxu0  ;;  %1676 = vmatpush3.bf16.msra.mxu0 %v1675_v22 }
 0x11a   : > { %v717_v31 = vadd.f32 %v1531_v30, %v2293_v24  ;;  %v711_v32 = vpop.f32.mrb[15].mxu0  ;;  %1677 = vmatprep.subr.bf16.mxu0 %v1927_v23 }
 0x11b   : > { %v1678_v33 = vpack.c.bf16 %v733_v28, %v732_v29  ;;  %v712_v34 = vadd.f32 %v2293_v24, %v711_v32  ;;  %1582 = vmatprep.mubr.f32.mxu1 %v732_v29 }
 0x11c   : > { %v735_v36 = vmax.f32 %v717_v31, 0.0  ;;  %1583 = vmatmul.mubr.f32.gmra.mrb[12].mxu1 %v733_v28 }
 0x11d   : > { %v734_v38 = vmax.f32 %v712_v34, 0.0  ;;  %1679 = vmatpush3.bf16.msra.mxu0 %v1678_v33 }
 0x11e   : > { %1680 = vmatprep.subr.bf16.mxu0 %v1927_v23 }
 0x11f   : > { %v1681_v39 = vpack.c.bf16 %v735_v36, %v734_v38  ;;  %1585 = vmatprep.mubr.f32.mxu1 %v734_v38 }
 0x120   : > { %1586 = vmatmul.mubr.f32.gmra.mrb[14].mxu1 %v735_v36 }
 0x121   : > { %1682 = vmatpush3.bf16.msra.mxu0 %v1681_v39 }
 0x1d7   : > { %v1566_v41 = vpop.f32.mrb[0].mxu1 }
 0x1d8   : > { %v831_v42 = vadd.f32 %v1566_v41, %v2321_v40  ;;  %v825_v24 = vpop.f32.mrb[1].mxu1 }
 0x1d9   : > { %v826_v43 = vadd.f32 %v2321_v40, %v825_v24 }
 0x1da   : > { %1763 = vtanh.f32 %v831_v42 }
 0x1db   : > { %v1569_v44 = vpop.f32.mrb[2].mxu1  ;;  %1765 = vtanh.f32 %v826_v43 }
 0x1dc   : > { %v841_v23 = vadd.f32 %v1569_v44, %v2321_v40  ;;  %v835_v46 = vpop.f32.mrb[3].mxu1 }
 0x1dd   : > { %v836_v48 = vadd.f32 %v2321_v40, %v835_v46 }
 0x1de   : > { %1767 = vtanh.f32 %v841_v23 }
 0x1df   : > { %v1572_v49 = vpop.f32.mrb[4].mxu1  ;;  %1769 = vtanh.f32 %v836_v48 }
 0x1e0   : > { %v851_v50 = vadd.f32 %v1572_v49, %v2321_v40  ;;  %v845_v51 = vpop.f32.mrb[5].mxu1 }
 0x1e1   : > { %v846_v52 = vadd.f32 %v2321_v40, %v845_v51 }
 0x1e3   : > { %1771 = vtanh.f32 %v846_v52  ;;  %v1575_v55 = vpop.f32.mrb[6].mxu1 }
 0x1e4   : > { %v1764_v57 = vpop.eup %1763  ;;  %1773 = vtanh.f32 %v851_v50  ;;  %v861_v58 = vadd.f32 %v1575_v55, %v2321_v40  ;;  %v855_v59 = vpop.f32.mrb[7].mxu1 }
 0x1e5   : > { %v856_v60 = vadd.f32 %v2321_v40, %v855_v59  ;;  %v928_v61 = vmul.f32 %v1764_v57, %v2332_v53  ;;  %v1766_v62 = vpop.eup %1765 }
 0x1e6   : > { %v927_v8 = vmul.f32 %v1766_v62, %v2332_v53  ;;  %v1928_v62 = vmov 0  }
 0x1e7   : > { %1775 = vtanh.f32 %v856_v60  ;;  %945 = vadd.xlane.f32.xlu0 %v928_v61  ;;  %v1578_v0 = vpop.f32.mrb[8].mxu1  ;;  %1761 = vset.pattern.permute.xlu1 %v1928_v62 }
 0x1e8   : > { %v1768_v1 = vpop.eup %1767  ;;  %1777 = vtanh.f32 %v861_v58  ;;  %v871_v2 = vadd.f32 %v1578_v0, %v2321_v40  ;;  %v865_v3 = vpop.f32.mrb[9].mxu1 }
 0x1e9   : > { %v866_v4 = vadd.f32 %v2321_v40, %v865_v3  ;;  %v930_v5 = vmul.f32 %v1768_v1, %v2332_v53  ;;  %v1770_v10 = vpop.eup %1769 }
 0x1ea   : > { %v929_v20 = vmul.f32 %v1770_v10, %v2332_v53 }
 0x1eb   : > { %1779 = vtanh.f32 %v866_v4  ;;  %949 = vadd.xlane.f32.xlu1 %v930_v5  ;;  %v1581_v12 = vpop.f32.mrb[10].mxu1  ;;  %943 = vadd.xlane.f32.xlu0 %v927_v8 }
 0x1ec   : > { %1781 = vtanh.f32 %v871_v2  ;;  %v881_v14 = vadd.f32 %v1581_v12, %v2321_v40  ;;  %v875_v16 = vpop.f32.mrb[11].mxu1 }
 0x1ed   : > { %v1772_v18 = vpop.eup %1771  ;;  %v876_v19 = vadd.f32 %v2321_v40, %v875_v16 }
 0x1ee   : > { %v1774_v22 = vpop.eup %1773  ;;  %v931_v26 = vmul.f32 %v1772_v18, %v2332_v53 }
 0x1ef   : > { %1783 = vtanh.f32 %v876_v19  ;;  %v1584_v28 = vpop.f32.mrb[12].mxu1  ;;  %947 = vadd.xlane.f32.xlu1 %v929_v20  ;;  %v932_v33 = vmul.f32 %v1774_v22, %v2332_v53 }
 0x1f0   : > { %1785 = vtanh.f32 %v881_v14  ;;  %v891_v29 = vadd.f32 %v1584_v28, %v2321_v40  ;;  %v885_v30 = vpop.f32.mrb[13].mxu1  ;;  %951 = vadd.xlane.f32.xlu0 %v931_v26 }
 0x1f1   : > { %v1776_v31 = vpop.eup %1775  ;;  %v886_v32 = vadd.f32 %v2321_v40, %v885_v30 }
 0x1f2   : > { %v1778_v34 = vpop.eup %1777  ;;  %v933_v36 = vmul.f32 %v1776_v31, %v2332_v53 }
 0x1f3   : > { %1787 = vtanh.f32 %v886_v32  ;;  %v1587_v38 = vpop.f32.mrb[14].mxu1  ;;  %953 = vadd.xlane.f32.xlu1 %v932_v33  ;;  %v934_v43 = vmul.f32 %v1778_v34, %v2332_v53 }
 0x1f4   : > { %1789 = vtanh.f32 %v891_v29  ;;  %v901_v39 = vadd.f32 %v1587_v38, %v2321_v40  ;;  %v895_v41 = vpop.f32.mrb[15].mxu1  ;;  %955 = vadd.xlane.f32.xlu0 %v933_v36 }
 0x1f5   : > { %v1780_v42 = vpop.eup %1779  ;;  %v896_v24 = vadd.f32 %v2321_v40, %v895_v41 }
 0x1f6   : > { %v1782_v44 = vpop.eup %1781  ;;  %v935_v23 = vmul.f32 %v1780_v42, %v2332_v53 }
 0x1f7   : > { %1791 = vtanh.f32 %v896_v24  ;;  %957 = vadd.xlane.f32.xlu1 %v934_v43  ;;  %v936_v48 = vmul.f32 %v1782_v44, %v2332_v53 }
 0x1f8   : > { %1793 = vtanh.f32 %v901_v39  ;;  %959 = vadd.xlane.f32.xlu0 %v935_v23 }
 0x1f9   : > { %v1784_v46 = vpop.eup %1783 }
 0x1fa   : > { %v1786_v49 = vpop.eup %1785  ;;  %v937_v50 = vmul.f32 %v1784_v46, %v2332_v53 }
 0x1fb   : > { %961 = vadd.xlane.f32.xlu1 %v936_v48  ;;  %v938_v40 = vmul.f32 %v1786_v49, %v2332_v53 }
 0x1fc   : > { %963 = vadd.xlane.f32.xlu0 %v937_v50 }
 0x1fd   : > { %v1788_v51 = vpop.eup %1787 }
 0x1fe   : > { %v1790_v52 = vpop.eup %1789  ;;  %v939_v55 = vmul.f32 %v1788_v51, %v2332_v53 }
 0x1ff   : > { %965 = vadd.xlane.f32.xlu1 %v938_v40  ;;  %v940_v58 = vmul.f32 %v1790_v52, %v2332_v53 }
 0x200   : > { %967 = vadd.xlane.f32.xlu0 %v939_v55 }
 0x201   : > { %v1792_v57 = vpop.eup %1791 }
 0x202   : > { %v1794_v59 = vpop.eup %1793  ;;  %v941_v60 = vmul.f32 %v1792_v57, %v2332_v53 }
 0x203   : > { %969 = vadd.xlane.f32.xlu1 %v940_v58  ;;  %v942_v61 = vmul.f32 %v1794_v59, %v2332_v53 }
 0x204   : > { %971 = vadd.xlane.f32.xlu0 %v941_v60 }
 0x207   : > { %973 = vadd.xlane.f32.xlu1 %v942_v61 }
 0x274   : > { %v946_v0 = vpop.xlane.xlu0 %945 }
 0x275   : > { %v976_v20 = vsel %vm438_vm3, %v946_v0, -1e+30 }
 0x278   : > { %v950_v1 = vpop.xlane.xlu1 %949  ;;  %v944_v2 = vpop.xlane.xlu0 %943 }
 0x279   : > { %v978_v22 = vsel %vm440_vm5, %v950_v1, -1e+30  ;;  %v975_v31 = vsel %vm437_vm2, %v944_v2, -1e+30 }
 0x27c   : > { %v948_v3 = vpop.xlane.xlu1 %947 }
 0x27d   : > { %v952_v4 = vpop.xlane.xlu0 %951  ;;  %v977_v32 = vsel %vm439_vm4, %v948_v3, -1e+30 }
 0x27e   : > { %v979_v26 = vsel %vm441_vm6, %v952_v4, -1e+30 }
 0x27f   : > { %v992_v24 = vmax.f32 %v975_v31, %v979_v26 }
 0x280   : > { %v954_v5 = vpop.xlane.xlu1 %953 }
 0x281   : > { %v956_v8 = vpop.xlane.xlu0 %955  ;;  %v2364_v53 = vsel %vm442_vm7, %v954_v5, -1e+30 }
 0x282   : > { %v2378_v28 = vsel %vm443_vm8, %v956_v8, -1e+30  ;;  %v993_v33 = vmax.f32 %v976_v20, %v2364_v53  ;;  %v991_v8 = vld [vmem:[%s2053_s14] sm:$0x1] }
 0x283   : > { %v994_v43 = vmax.f32 %v977_v32, %v2378_v28 }
 0x284   : > { %v958_v10 = vpop.xlane.xlu1 %957 }
 0x285   : > { %v960_v12 = vpop.xlane.xlu0 %959  ;;  %v2383_v29 = vsel %vm444_vm9, %v958_v10, -1e+30  ;;  %v1020_v10 = vsub.s32 0, %v2080_v6 }
 0x286   : > { %v2400_v34 = vsel %vm445_vm10, %v960_v12, -1e+30  ;;  %v995_v44 = vmax.f32 %v978_v22, %v2383_v29 }
 0x287   : > { %v996_v49 = vmax.f32 %v992_v24, %v2400_v34 }
 0x288   : > { %v962_v14 = vpop.xlane.xlu1 %961 }
 0x289   : > { %v964_v16 = vpop.xlane.xlu0 %963  ;;  %v2388_v30 = vsel %vm446_vm11, %v962_v14, -1e+30 }
 0x28a   : > { %v2405_v38 = vsel %vm447_vm12, %v964_v16, -1e+30  ;;  %v997_v23 = vmax.f32 %v993_v33, %v2388_v30 }
 0x28b   : > { %v998_v50 = vmax.f32 %v994_v43, %v2405_v38 }
 0x28c   : > { %v966_v18 = vpop.xlane.xlu1 %965 }
 0x28d   : > { %v968_v19 = vpop.xlane.xlu0 %967  ;;  %v2410_v39 = vsel %vm448_vm13, %v966_v18, -1e+30 }
 0x28e   : > { %v2423_v46 = vsel %vm2640_vm1, %v968_v19, -1e+30  ;;  %v999_v51 = vmax.f32 %v995_v44, %v2410_v39  ;;  %vm2628_vm1 = vcmask 0  }
 0x28f   : > { %v1000_v57 = vmax.f32 %v996_v49, %v2423_v46 }
 0x290   : > { %v970_v36 = vpop.xlane.xlu1 %969 }
 0x291   : > { %v2415_v41 = vsel %vm450_vm15, %v970_v36, -1e+30  ;;  %v972_v42 = vpop.xlane.xlu0 %971 }
 0x292   : > { %v2428_v48 = vsel %vm451_vm0, %v972_v42, -1e+30  ;;  %v1001_v40 = vmax.f32 %v997_v23, %v2415_v41 }
 0x293   : > { %v1002_v58 = vmax.f32 %v998_v50, %v2428_v48 }
 0x294   : > { %v974_v52 = vpop.xlane.xlu1 %973  ;;  %v1004_v60 = vmax.f32 %v1000_v57, %v1001_v40 }
 0x295   : > { %v2437_v55 = vsel %vm2629_vm14, %v974_v52, -1e+30  ;;  %vm1929_vm14 = vmmov 0  }
 0x296   : > { %v1003_v59 = vmax.f32 %v999_v51, %v2437_v55 }
 0x298   : > { %v1005_v61 = vmax.f32 %v1002_v58, %v1003_v59  ;;  %v1930_v59 = vmov 0.0  }
 0x299   : > { %1620 = vmatprep.mubr.msk.f32.mxu0 %vm1929_vm14, %v1930_v59 }
 0x29a   : > { %v1006_v0 = vmax.f32 %v1004_v60, %v1005_v61 }
 0x29c   : > { %v1007_v1 = vrot.slane %v1006_v0, 4 }
 0x29e   : > { %v1008_v2 = vmax.f32 %v1006_v0, %v1007_v1 }
 0x2a0   : > { %v1009_v3 = vrot.slane %v1008_v2, 2 }
 0x2a2   : > { %v1010_v4 = vmax.f32 %v1008_v2, %v1009_v3 }
 0x2a4   : > { %v1011_v5 = vrot.slane %v1010_v4, 1 }
 0x2a6   : > { %v1012_v12 = vmax.f32 %v1010_v4, %v1011_v5 }
 0x2a8   : > { %v1013_v14 = vmax.f32 %v991_v8, %v1012_v12 }
 0x2aa   : > { %v1014_v16 = vsub.f32 %v991_v8, %v1013_v14  ;;  %v2446_v18 = vrot.slane %v1013_v14, %v1020_v10  ;;  %1245 = vst.msk [vmem:[%s2053_s14] sm:$0x1] %vm2628_vm1, %v1013_v14  ;;  %vm1089_vm1 = vcmask 7168   ;;  %s1434_s14 = sshll.u32 %s1911_s9, 4  ;;  %s1931_s9 = smov [#allocation2]  }
 0x2ab   : > { %s2557_s30 = scalar_lea.hbm %s2621_s8, %s1434_s14  ;;  %s1833_s26 = sshll.u32 %s1931_s9, 4  ;;  %s1834_s26 = int_to_ptr.vmem [resolvable:$false] %s1833_s26 }
 0x2ac   : > { %v1015_v19 = vmul.f32 1.442695, %v1014_v16  ;;  %v1023_v33 = vsub.f32 %v975_v31, %v2446_v18  ;;  %v1024_v36 = vsub.f32 %v976_v20, %v2446_v18  ;;  %v1025_v42 = vsub.f32 %v977_v32, %v2446_v18  ;;  %s1835_s13 = scalar_lea.vmem %s1834_s26, 32  ;;  %p1836_p5 = scmp.lt.s32.totalorder %s2559_s22, %s1834_s26 }
 0x2ad   : > { %v1026_v24 = vsub.f32 %v978_v22, %v2446_v18  ;;  %v1027_v43 = vsub.f32 %v979_v26, %v2446_v18  ;;  %v1028_v49 = vsub.f32 %v2364_v53, %v2446_v18  ;;  %v1029_v40 = vsub.f32 %v2378_v28, %v2446_v18  ;;  %p1837_p6 = scmp.lt.s32.totalorder %s1835_s13, %s1829_s25 }
 0x2ae   : > { %1795 = vpow2.f32 %v1015_v19  ;;  %v1039_v44 = vmul.f32 1.442695, %v1023_v33  ;;  %v1041_v23 = vmul.f32 1.442695, %v1024_v36  ;;  %v1043_v50 = vmul.f32 1.442695, %v1025_v42 }
 0x2af   : > { %v1045_v51 = vmul.f32 1.442695, %v1026_v24  ;;  %v1047_v31 = vmul.f32 1.442695, %v1027_v43  ;;  %v1049_v20 = vmul.f32 1.442695, %v1028_v49  ;;  %v1030_v22 = vsub.f32 %v2383_v29, %v2446_v18  ;;  %p1838_p7 = por %p1837_p6, %p1836_p5 }
 0x2b0   : > { %1797 = vpow2.f32 %v1039_v44  ;;  %v1051_v26 = vmul.f32 1.442695, %v1029_v40  ;;  %v1031_v32 = vsub.f32 %v2400_v34, %v2446_v18  ;;  %v1032_v52 = vsub.f32 %v2388_v30, %v2446_v18 }
 0x2b1   : > { %1799 = vpow2.f32 %v1041_v23  ;;  %v1053_v53 = vmul.f32 1.442695, %v1030_v22  ;;  %v1033_v58 = vsub.f32 %v2405_v38, %v2446_v18  ;;  %v1034_v29 = vsub.f32 %v2410_v39, %v2446_v18  ;;  %p1839_p8 = pnand %p1838_p7, %p1832_p4 }
 0x2b2   : > { %1801 = vpow2.f32 %v1043_v50  ;;  %v1055_v57 = vmul.f32 1.442695, %v1031_v32  ;;  %v1057_v34 = vmul.f32 1.442695, %v1032_v52  ;;  %v1035_v38 = vsub.f32 %v2423_v46, %v2446_v18 }
 0x2b3   : > { %1803 = vpow2.f32 %v1045_v51  ;;  %v1059_v0 = vmul.f32 1.442695, %v1033_v58  ;;  %v1061_v3 = vmul.f32 1.442695, %v1034_v29  ;;  %v1036_v46 = vsub.f32 %v2415_v41, %v2446_v18 }
 0x2b4   : > { %1805 = vpow2.f32 %v1047_v31  ;;  %v1063_v33 = vmul.f32 1.442695, %v1035_v38  ;;  %v1037_v36 = vsub.f32 %v2428_v48, %v2446_v18  ;;  %v1038_v24 = vsub.f32 %v2437_v55, %v2446_v18 }
 0x2b5   : > { %1807 = vpow2.f32 %v1049_v20  ;;  %v1065_v43 = vmul.f32 1.442695, %v1036_v46 }
 0x2b6   : > { %1809 = vpow2.f32 %v1051_v26  ;;  %v1067_v50 = vmul.f32 1.442695, %v1037_v36  ;;  %v1069_v51 = vmul.f32 1.442695, %v1038_v24  ;;  %v1087_v36 = vld [vmem:[%s2058_s16] sm:$0x1] }
 0x2b7   : > { %1811 = vpow2.f32 %v1053_v53 }
 0x2b8   : > { %v2465_v28 = vpop.eup %1795  ;;  %1813 = vpow2.f32 %v1055_v57 }
 0x2b9   : > { %1235 = vperm.xlu1 %1761, %v2465_v28   ;;  %1815 = vpow2.f32 %v1057_v34 }
 0x2ba   : > { %v1798_v60 = vpop.eup %1797  ;;  %1817 = vpow2.f32 %v1059_v0 }
 0x2bb   : > { %v1800_v30 = vpop.eup %1799  ;;  %v1071_v61 = vsel %vm437_vm2, %v1798_v60, 0.0  ;;  %1819 = vpow2.f32 %v1061_v3  ;;  %vm2641_vm2 = vcmp.lt.s32.totalorder %v2203_v47, %v2082_v7 }
 0x2bc   : > { %v1802_v1 = vpop.eup %1801  ;;  %1130 = vxpose.xlu0.b32.start [1/16] (narrow) %v1071_v61, 8  ;;  %v1090_v39 = vsel %vm1089_vm1, %v1071_v61, 0.0  ;;  %v1072_v2 = vsel %vm438_vm3, %v1800_v30, 0.0  ;;  %1821 = vpow2.f32 %v1063_v33  ;;  %vm2642_vm3 = vcmp.lt.s32.totalorder %v2249_v63, %v2082_v7 }
 0x2bd   : > { %v1804_v4 = vpop.eup %1803  ;;  %v1091_v5 = vsel %vm1089_vm1, %v1072_v2, 0.0  ;;  %v1073_v8 = vsel %vm439_vm4, %v1802_v1, 0.0  ;;  %1823 = vpow2.f32 %v1065_v43  ;;  %v1088_v7 = vmul.f32 %v2465_v28, %v1087_v36 }
 0x2be   : > { %v1806_v12 = vpop.eup %1805  ;;  %v1092_v14 = vadd.f32 %v1091_v5, %v1090_v39  ;;  %v1074_v16 = vsel %vm440_vm5, %v1804_v4, 0.0  ;;  %v1093_v19 = vsel %vm1089_vm1, %v1073_v8, 0.0  ;;  %1825 = vpow2.f32 %v1067_v50 }
 0x2bf   : > { %v1808_v9 = vpop.eup %1807  ;;  %v1075_v41 = vsel %vm441_vm6, %v1806_v12, 0.0  ;;  %v1095_v13 = vsel %vm1089_vm1, %v1074_v16, 0.0  ;;  %1827 = vpow2.f32 %v1069_v51  ;;  %vm2643_vm4 = vcmask 0  }
 0x2c0   : > { %1131 = vxpose.xlu0.b32.cont [2/16] (narrow) %v1072_v2, 8  ;;  %v1094_v11 = vadd.f32 %v1093_v19, %v1092_v14  ;;  %v1810_v42 = vpop.eup %1809  ;;  %v1076_v23 = vsel %vm442_vm7, %v1808_v9, 0.0  ;;  %v1097_v49 = vsel %vm1089_vm1, %v1075_v41, 0.0 }
 0x2c1   : > { %v1812_v48 = vpop.eup %1811  ;;  %v1077_v55 = vsel %vm443_vm8, %v1810_v42, 0.0  ;;  %v1099_v40 = vsel %vm1089_vm1, %v1076_v23, 0.0 }
 0x2c2   : > { %v1096_v44 = vadd.f32 %v1095_v13, %v1094_v11  ;;  %v1814_v18 = vpop.eup %1813  ;;  %v1078_v17 = vsel %vm444_vm9, %v1812_v48, 0.0  ;;  %v1101_v22 = vsel %vm1089_vm1, %v1077_v55, 0.0  ;;  %v1232_v13 = vld [vmem:[%s2067_s18] sm:$0x1] }
 0x2c3   : > { %v1816_v20 = vpop.eup %1815  ;;  %v1079_v21 = vsel %vm445_vm10, %v1814_v18, 0.0  ;;  %v1103_v53 = vsel %vm1089_vm1, %v1078_v17, 0.0 }
 0x2c4   : > { %1132 = vxpose.xlu0.b32.cont [3/16] (narrow) %v1073_v8, 8  ;;  %v1098_v15 = vadd.f32 %v1097_v49, %v1096_v44  ;;  %v1818_v32 = vpop.eup %1817  ;;  %v1080_v25 = vsel %vm446_vm11, %v1816_v20, 0.0  ;;  %v1105_v58 = vsel %vm1089_vm1, %v1079_v21, 0.0 }
 0x2c5   : > { %v1820_v57 = vpop.eup %1819  ;;  %v1081_v34 = vsel %vm447_vm12, %v1818_v32, 0.0  ;;  %v1107_v59 = vsel %vm1089_vm1, %v1080_v25, 0.0 }
 0x2c6   : > { %v1100_v31 = vadd.f32 %v1099_v40, %v1098_v15  ;;  %v1822_v27 = vpop.eup %1821  ;;  %v1082_v30 = vsel %vm448_vm13, %v1820_v57, 0.0  ;;  %v1109_v35 = vsel %vm1089_vm1, %v1081_v34, 0.0 }
 0x2c7   : > { %v1824_v61 = vpop.eup %1823  ;;  %v1083_v38 = vsel %vm2641_vm2, %v1822_v27, 0.0  ;;  %v1111_v37 = vsel %vm1089_vm1, %v1082_v30, 0.0 }
 0x2c8   : > { %1133 = vxpose.xlu0.b32.cont [4/16] (narrow) %v1074_v16, 8  ;;  %v1102_v26 = vadd.f32 %v1101_v22, %v1100_v31  ;;  %v1826_v1 = vpop.eup %1825  ;;  %v1084_v2 = vsel %vm450_vm15, %v1824_v61, 0.0  ;;  %v1113_v45 = vsel %vm1089_vm1, %v1083_v38, 0.0 }
 0x2c9   : > { %v1828_v3 = vpop.eup %1827  ;;  %v1085_v5 = vsel %vm451_vm0, %v1826_v1, 0.0  ;;  %v1115_v47 = vsel %vm1089_vm1, %v1084_v2, 0.0 }
 0x2ca   : > { %v1104_v52 = vadd.f32 %v1103_v53, %v1102_v26  ;;  %v1086_v46 = vsel %vm2642_vm3, %v1828_v3, 0.0  ;;  %v1117_v54 = vsel %vm1089_vm1, %v1085_v5, 0.0 }
 0x2cb   : > { %v1119_v14 = vsel %vm1089_vm1, %v1086_v46, 0.0 }
 0x2cc   : > { %1134 = vxpose.xlu0.b32.cont [5/16] (narrow) %v1075_v41, 8  ;;  %v1106_v29 = vadd.f32 %v1105_v58, %v1104_v52 }
 0x2ce   : > { %v1108_v60 = vadd.f32 %v1107_v59, %v1106_v29 }
 0x2d0   : > { %1135 = vxpose.xlu0.b32.cont [6/16] (narrow) %v1076_v23, 8  ;;  %v1110_v0 = vadd.f32 %v1109_v35, %v1108_v60 }
 0x2d2   : > { %v1112_v39 = vadd.f32 %v1111_v37, %v1110_v0 }
 0x2d4   : > { %1136 = vxpose.xlu0.b32.cont [7/16] (narrow) %v1077_v55, 8  ;;  %v1114_v4 = vadd.f32 %v1113_v45, %v1112_v39 }
 0x2d6   : > { %v1116_v8 = vadd.f32 %v1115_v47, %v1114_v4 }
 0x2d8   : > { %1137 = vxpose.xlu0.b32.cont [8/16] (narrow) %v1078_v17, 8  ;;  %v1118_v12 = vadd.f32 %v1117_v54, %v1116_v8 }
 0x2da   : > { %v1120_v16 = vadd.f32 %v1119_v14, %v1118_v12 }
 0x2dc   : > { %1138 = vxpose.xlu0.b32.cont [9/16] (narrow) %v1079_v21, 8  ;;  %v1121_v9 = vrot.slane %v1120_v16, 4 }
 0x2de   : > { %v1122_v56 = vadd.f32 %v1121_v9, %v1120_v16 }
 0x2e0   : > { %1139 = vxpose.xlu0.b32.cont [10/16] (narrow) %v1080_v25, 8  ;;  %v1123_v19 = vrot.slane %v1122_v56, 2 }
 0x2e2   : > { %v1124_v33 = vadd.f32 %v1123_v19, %v1122_v56 }
 0x2e4   : > { %1140 = vxpose.xlu0.b32.cont [11/16] (narrow) %v1081_v34, 8  ;;  %v1125_v11 = vrot.slane %v1124_v33, 1 }
 0x2e6   : > { %v1126_v63 = vadd.f32 %v1125_v11, %v1124_v33 }
 0x2e8   : > { %1141 = vxpose.xlu0.b32.cont [12/16] (narrow) %v1082_v30, 8  ;;  %v1127_v41 = vadd.f32 %v1126_v63, %v1088_v7 }
 0x2ea   : > { %1129 = vst.msk [vmem:[%s2058_s16] sm:$0x1] %vm2643_vm4, %v1127_v41 }
 0x2ec   : > { %1142 = vxpose.xlu0.b32.cont [13/16] (narrow) %v1083_v38, 8 }
 0x2f0   : > { %1143 = vxpose.xlu0.b32.cont [14/16] (narrow) %v1084_v2, 8 }
 0x2f4   : > { %1144 = vxpose.xlu0.b32.cont [15/16] (narrow) %v1085_v5, 8 }
 0x2f8   : > { %1145 = vxpose.xlu0.b32.end [16/16] (narrow) %v1086_v46, 8 }
 0x321   : > { %1762 = vset.pattern.permute.xlu0 %v1928_v62 }
 0x338   : > { %v1236_v24 = vpop.permute.xlu1 %1235 }
 0x339   : > { %v1241_v28 = vrot.slane %v1236_v24, %v1020_v10 }
 0x33b   : > { %v1242_v43 = vmul.f32 %v1241_v28, %v1232_v13 }
 0x33c   : > { %v1146_v42 = vpop.trf.xlu0 }
 0x33d   : > { %1621 = vmatmul.mubr.f32.vlgmr.msra.gmra.mrb[16].mxu0 %v1146_v42 }
 0x410   : > { %v1228_v44 = vpop.f32.mrb[16].mxu0 }
 0x411   : > { %v1243_v23 = vadd.f32 %v1242_v43, %v1228_v44  ;;  %v1622_v48 = vpop.f32.mrb[17].mxu0 }
 0x413   : > { %1244 = vst [vmem:[%s2067_s18] sm:$0x1] %v1243_v23 }
 0x414   : > { %1842 = shalt.err (!%p1839_p8)
}
 0x415   : > { %s1843_s18 = scalar_lea.hbm %s2557_s30, 16  ;;  %s1847_s15 = scalar_lea.hbm %s2621_s8, 32 }
 0x416   : > { %p1844_p10 = scmp.ne.s32.totalorder %s2557_s30, %s1843_s18  ;;  %p1848_p13 = scmp.lt.u32.totalorder %s2557_s30, %s2621_s8 }
 0x417   : > { %p1849_p0 = scmp.lt.u32.totalorder %s1847_s15, %s1843_s18  ;;  %p1851_p2 = scmp.lt.u32.totalorder %s1843_s18, %s2557_s30 }
 0x418   : > { %p1845_p11 = pnand %p1844_p10, %p2026_p3 }
 0x419   : > { %p1850_p1 = por %p1849_p0, %p1848_p13 }
 0x41a   : > { %p1846_p12 = pneg %p1845_p11 }
 0x41b   : > { %p1852_p4 = por %p1851_p2, %p1850_p1 }
 0x41d   : > { %p1853_p5 = pnand %p1852_p4, %p1846_p12 }
 0x41f   : > { %1856 = shalt.err (!%p1853_p5)
}
 0x420   : > { %1684 = dma.vmem_to_hbm [thread:$0]  (%p2026_p3), %s2559_s22, 16, %s2557_s30, %s1259_s21  }
 0x421 PF: > { %p1690_p6 = scmp.ge.s32.totalorder %s1923_s12, 2  ;;  %s1308_s14 = sand.u32 1, %s1895_s27  }
 0x422   : > { %s1309_s16 = scalar_lea.sflag [#allocation3], %s1308_s14 }
 0x423   : > { %p1687_p7 = pnand %p1690_p6, %p2036_p9 }
 0x425   : > { %1890 = dma.done.wait (!%p1687_p7), %s1309_s16, 16  }
 0x426   : > { %1892 = vsyncadd (!%p1687_p7), %s1309_s16, 4294967280  ;;  %s22_s12 = sadd.s32 1, %s1923_s12   ;;  %s2646_s23 = sld [smem:[#allocation5_spill]] }
 0x427   : > { %p19_p8 = scmp.ge.s32.totalorder %s22_s12, 8   ;;  %s2647_s29 = sld [smem:[#allocation11_spill]] }
 0x428   : > { %s2648_s30 = sld [smem:[#allocation6_spill]]  ;;  %s2649_s9 = sld [smem:[#allocation7_spill]] }
 0x429   : > { %s2650_s10 = sld [smem:[#allocation8_spill]]  ;;  %s2651_s11 = sld [smem:[#allocation9_spill]] }
 0x42a   : > { %s2652_s27 = smov %s1899_s28  ;;  %21 = sbr.rel (!%p19_p8) target bundleno = 5 (0x5), region = 107 }
 0x42c   : > { %s2653_s28 = smov %s2646_s23 }
 0x431   :  { %1313 = vsyncpa [#allocation3], 1 }
 0x432   :  { %1315 = vsyncpa [#allocation3 + $0x1], 1 }

</bundles_post_ra>
